<compile_context>
chip_gen: v7x
topology: tpu7x:2x2x1
jax: 0.10.0
libtpu: 0.0.40
codegen_flags: <defaults>
</compile_context>

<pallas_src>
import math

import jax
import jax.numpy as jnp
from jax.experimental import pallas as pl
from jax.experimental.pallas import tpu as pltpu


# -----------------------------------------------------------------------------
# Tiled linear:  y = x @ W + b   (input projection of each LSTM layer)
# -----------------------------------------------------------------------------
def _linear_kernel(x_ref, w_ref, b_ref, o_ref, acc_ref):
    @pl.when(pl.program_id(2) == 0)
    def _():
        acc_ref[...] = jnp.zeros_like(acc_ref)

    acc_ref[...] += jnp.dot(x_ref[...], w_ref[...],
                            preferred_element_type=jnp.float32)

    @pl.when(pl.program_id(2) == pl.num_programs(2) - 1)
    def _():
        o_ref[...] = (acc_ref[...] + b_ref[...]).astype(o_ref.dtype)


def _pick_tile(dim, want, align):
    """Use `want` if it divides `dim` and is `align`-aligned, else the full dim
    (full-extent blocks are exempt from the (8,128) constraint)."""
    if dim % want == 0 and want % align == 0:
        return want
    return dim


def linear(x, w, b, *, tm=256, tk=512, tn=512):
    """x: (M, K), w: (K, N), b: (N,) -> (M, N) with f32 MXU accumulation."""
    M, K = x.shape
    N = w.shape[1]
    tm = _pick_tile(M, tm, 8)
    tk = _pick_tile(K, tk, 128)
    tn = _pick_tile(N, tn, 128)
    grid = (M // tm, N // tn, K // tk)
    return pl.pallas_call(
        _linear_kernel,
        out_shape=jax.ShapeDtypeStruct((M, N), x.dtype),
        grid=grid,
        in_specs=[
            pl.BlockSpec((tm, tk), lambda i, j, k: (i, k)),
            pl.BlockSpec((tk, tn), lambda i, j, k: (k, j)),
            pl.BlockSpec((1, tn), lambda i, j, k: (0, j)),
        ],
        out_specs=pl.BlockSpec((tm, tn), lambda i, j, k: (i, j)),
        scratch_shapes=[pltpu.VMEM((tm, tn), jnp.float32)],
        compiler_params=pltpu.CompilerParams(
            dimension_semantics=("parallel", "parallel", "arbitrary")),
    )(x, w, b.reshape(1, N))


# -----------------------------------------------------------------------------
# LSTM recurrence (single pallas_call per layer; W_hh resident, h/c in VMEM scratch)
# -----------------------------------------------------------------------------
def _lstm_cell_step(xp_row, h, c, whh, H):
    """One LSTM timestep. PyTorch gate order [i, f, g, o]."""
    gates = xp_row.astype(jnp.float32) + jnp.dot(
        h, whh, preferred_element_type=jnp.float32)           # (tb, 4H)
    i = jax.nn.sigmoid(gates[:, 0 * H:1 * H])
    f = jax.nn.sigmoid(gates[:, 1 * H:2 * H])
    g = jnp.tanh(gates[:, 2 * H:3 * H])
    o = jax.nn.sigmoid(gates[:, 3 * H:4 * H])
    c_new = f * c + i * g
    h_new = o * jnp.tanh(c_new)
    return h_new, c_new


def _lstm_seq_kernel(xp_ref, whh_ref, y_ref, h_scr, c_scr):
    """xp_ref: (S, tb, 4H) precomputed x@W_ih+b; emits full sequence y: (S, tb, H)."""
    S = xp_ref.shape[0]
    H = h_scr.shape[-1]
    h_scr[...] = jnp.zeros_like(h_scr)
    c_scr[...] = jnp.zeros_like(c_scr)
    whh = whh_ref[...]                      # resident in VMEM for all timesteps

    def step(t, carry):
        h, c = _lstm_cell_step(xp_ref[t], h_scr[...], c_scr[...], whh, H)
        h_scr[...] = h
        c_scr[...] = c
        y_ref[t] = h.astype(y_ref.dtype)
        return carry

    jax.lax.fori_loop(0, S, step, 0)


def _lstm_head_kernel(xp_ref, whh_ref, wfc_ref, bfc_ref, o_ref, h_scr, c_scr):
    """Top layer: recurrence + fused classifier head on the last hidden state."""
    S = xp_ref.shape[0]
    H = h_scr.shape[-1]
    h_scr[...] = jnp.zeros_like(h_scr)
    c_scr[...] = jnp.zeros_like(c_scr)
    whh = whh_ref[...]

    def step(t, carry):
        h, c = _lstm_cell_step(xp_ref[t], h_scr[...], c_scr[...], whh, H)
        h_scr[...] = h
        c_scr[...] = c
        return carry

    jax.lax.fori_loop(0, S, step, 0)
    # dropout before fc: identity in eval mode.
    logits = jnp.dot(h_scr[...], wfc_ref[...],
                     preferred_element_type=jnp.float32) + bfc_ref[...]
    o_ref[...] = logits.astype(o_ref.dtype)


def _batch_tile(B):
    # Parallel batch tiling (megacore-friendly) when B is 8-aligned; else whole batch.
    return 8 if (B % 8 == 0 and B >= 8) else B


def lstm_seq(xproj, w_hh):
    """xproj: (S, B, 4H), w_hh: (H, 4H) -> full-sequence hidden states (S, B, H)."""
    S, B, G = xproj.shape
    H = w_hh.shape[0]
    tb = _batch_tile(B)
    nb = B // tb
    return pl.pallas_call(
        _lstm_seq_kernel,
        out_shape=jax.ShapeDtypeStruct((S, B, H), xproj.dtype),
        grid=(nb,),
        in_specs=[
            pl.BlockSpec((S, tb, G), lambda b: (0, b, 0)),
            pl.BlockSpec((H, G), lambda b: (0, 0)),
        ],
        out_specs=pl.BlockSpec((S, tb, H), lambda b: (0, b, 0)),
        scratch_shapes=[pltpu.VMEM((tb, H), jnp.float32),
                        pltpu.VMEM((tb, H), jnp.float32)],
        compiler_params=pltpu.CompilerParams(dimension_semantics=("parallel",)),
    )(xproj, w_hh)


def lstm_head(xproj, w_hh, w_fc, b_fc):
    """Top LSTM layer with fused final linear: (S, B, 4H) -> (B, C) logits."""
    S, B, G = xproj.shape
    H = w_hh.shape[0]
    C = w_fc.shape[1]
    tb = _batch_tile(B)
    nb = B // tb
    return pl.pallas_call(
        _lstm_head_kernel,
        out_shape=jax.ShapeDtypeStruct((B, C), xproj.dtype),
        grid=(nb,),
        in_specs=[
            pl.BlockSpec((S, tb, G), lambda b: (0, b, 0)),
            pl.BlockSpec((H, G), lambda b: (0, 0)),
            pl.BlockSpec((H, C), lambda b: (0, 0)),
            pl.BlockSpec((1, C), lambda b: (0, 0)),
        ],
        out_specs=pl.BlockSpec((tb, C), lambda b: (b, 0)),
        scratch_shapes=[pltpu.VMEM((tb, H), jnp.float32),
                        pltpu.VMEM((tb, H), jnp.float32)],
        compiler_params=pltpu.CompilerParams(dimension_semantics=("parallel",)),
    )(xproj, w_hh, w_fc, b_fc.reshape(1, C))


# -----------------------------------------------------------------------------
# Model glue (parameters + forward)
# -----------------------------------------------------------------------------
def init_params(key, *, ntokens, embedding_size, hidden_size, n_layers, n_classes):
    """Weights stored as (in, out) so kernels compute x @ W + b (== PyTorch x @ W.T + b).
    b_ih and b_hh are folded into a single bias (both are added every step)."""
    keys = iter(jax.random.split(key, 2 + 3 * n_layers))
    k = 1.0 / math.sqrt(hidden_size)
    params = {
        "embedding": jax.random.normal(next(keys), (ntokens, embedding_size), jnp.float32),
        "fc_w": jax.random.uniform(next(keys), (hidden_size, n_classes),
                                   jnp.float32, -k, k),
        "fc_b": jnp.zeros((n_classes,), jnp.float32),
        "lstm": [],
    }
    in_dim = embedding_size
    for _ in range(n_layers):
        params["lstm"].append({
            "w_ih": jax.random.uniform(next(keys), (in_dim, 4 * hidden_size),
                                       jnp.float32, -k, k),
            "w_hh": jax.random.uniform(next(keys), (hidden_size, 4 * hidden_size),
                                       jnp.float32, -k, k),
            "b": jax.random.uniform(next(keys), (4 * hidden_size,),
                                    jnp.float32, -k, k),
        })
        in_dim = hidden_size
    return params


def sentiment_forward(X, params):
    """X: (B, S) int32 token ids -> (B, n_classes) logits.
    embedding -> n-layer LSTM (zero initial state) -> last timestep -> dropout(id) -> fc."""
    # Embedding gather, directly into time-major (S, B, E) layout (XLA gather glue).
    # TODO(synk): could be expressed as a scalar-prefetch Element-gather Pallas kernel.
    emb = params["embedding"][X.T]                       # (S, B, E)
    S, B, _ = emb.shape
    h = emb
    n_layers = len(params["lstm"])
    logits = None
    for li, layer in enumerate(params["lstm"]):
        d_in = h.shape[-1]
        xp = linear(h.reshape(S * B, d_in), layer["w_ih"], layer["b"])   # (S*B, 4H)
        xp = xp.reshape(S, B, xp.shape[-1])                              # (S, B, 4H)
        if li < n_layers - 1:
            h = lstm_seq(xp, layer["w_hh"])                              # (S, B, H)
            # TODO(synk): inter-layer dropout (p=0.25) not implemented (eval-mode identity).
        else:
            logits = lstm_head(xp, layer["w_hh"], params["fc_w"], params["fc_b"])
    return logits


# -----------------------------------------------------------------------------
if __name__ == "__main__":
    # Small shapes consistent with the module's constructor semantics.
    B, S = 2, 8
    ntokens = 100
    embedding_size = 64
    hidden_size = 64
    n_layers = 2
    n_classes = 2

    key = jax.random.PRNGKey(0)
    pkey, xkey = jax.random.split(key)
    params = init_params(pkey, ntokens=ntokens, embedding_size=embedding_size,
                         hidden_size=hidden_size, n_layers=n_layers,
                         n_classes=n_classes)
    X = jax.random.randint(xkey, (B, S), 0, ntokens, dtype=jnp.int32)

    logits = jax.jit(sentiment_forward)(X, params)
    logits = jax.block_until_ready(logits)
    assert logits.shape == (B, n_classes) and logits.dtype == jnp.float32
    assert bool(jnp.all(jnp.isfinite(logits)))
    print("KERNEL_OK")
</pallas_src>

<mosaic_0001>
module attributes {stable_mosaic.version = 11 : i64} {
  func.func @_linear_kernel(%arg0: i32, %arg1: i32, %arg2: i32, %arg3: memref<16x64xf32, #tpu.memory_space<vmem>>, %arg4: memref<64x256xf32, #tpu.memory_space<vmem>>, %arg5: memref<1x256xf32, #tpu.memory_space<vmem>>, %arg6: memref<16x256xf32, #tpu.memory_space<vmem>>, %arg7: memref<16x256xf32, #tpu.memory_space<vmem>>) attributes {dimension_semantics = [#tpu.dimension_semantics<parallel>, #tpu.dimension_semantics<parallel>, #tpu.dimension_semantics<arbitrary>], iteration_bounds = array<i64: 1, 1, 1>, scalar_prefetch = 0 : i64, scratch_operands = 1 : i64, tpu.core_type = #tpu.core_type<tc>, window_params = [{transform_indices = @transform_0, window_bounds = array<i64: 16, 64>}, {transform_indices = @transform_1, window_bounds = array<i64: 64, 256>}, {transform_indices = @transform_2, window_bounds = array<i64: 1, 256>}, {transform_indices = @transform_3, window_bounds = array<i64: 16, 256>}]} {
    %c0_i32 = arith.constant 0 : i32
    %0 = arith.cmpi eq, %arg2, %c0_i32 : i32
    %1 = arith.extui %0 : i1 to i32
    %c0_i32_0 = arith.constant 0 : i32
    %2 = arith.cmpi ne, %1, %c0_i32_0 : i32
    scf.if %2 {
      %cst_10 = arith.constant 0.000000e+00 : f32
      %12 = vector.broadcast %cst_10 : f32 to vector<16x256xf32>
      %c0_11 = arith.constant 0 : index
      %c0_12 = arith.constant 0 : index
      %13 = vector.load %arg7[%c0_11, %c0_12] : memref<16x256xf32, #tpu.memory_space<vmem>>, vector<16x256xf32>
      tpu.vector_store %arg7[%c0_11, %c0_12], %12 {strides = array<i32>} : memref<16x256xf32, #tpu.memory_space<vmem>>, vector<16x256xf32>,
    } else {
    }
    %c0 = arith.constant 0 : index
    %c0_1 = arith.constant 0 : index
    %3 = vector.load %arg7[%c0, %c0_1] : memref<16x256xf32, #tpu.memory_space<vmem>>, vector<16x256xf32>
    %c0_2 = arith.constant 0 : index
    %c0_3 = arith.constant 0 : index
    %4 = vector.load %arg3[%c0_2, %c0_3] : memref<16x64xf32, #tpu.memory_space<vmem>>, vector<16x64xf32>
    %c0_4 = arith.constant 0 : index
    %c0_5 = arith.constant 0 : index
    %5 = vector.load %arg4[%c0_4, %c0_5] : memref<64x256xf32, #tpu.memory_space<vmem>>, vector<64x256xf32>
    %cst = arith.constant dense<0.000000e+00> : vector<16x256xf32>
    %6 = tpu.matmul %4, %5, %cst {dimension_numbers = #tpu.dot_dimension_numbers<[1], [0], [0], [1], [0, 0, 1, 1], [], []>} : vector<16x64xf32>, vector<64x256xf32>, vector<16x256xf32> -> vector<16x256xf32>
    %7 = arith.addf %3, %6 : vector<16x256xf32>
    %c0_6 = arith.constant 0 : index
    %c0_7 = arith.constant 0 : index
    %8 = vector.load %arg7[%c0_6, %c0_7] : memref<16x256xf32, #tpu.memory_space<vmem>>, vector<16x256xf32>
    tpu.vector_store %arg7[%c0_6, %c0_7], %7 {strides = array<i32>} : memref<16x256xf32, #tpu.memory_space<vmem>>, vector<16x256xf32>,
    %c0_i32_8 = arith.constant 0 : i32
    %9 = arith.cmpi eq, %arg2, %c0_i32_8 : i32
    %10 = arith.extui %9 : i1 to i32
    %c0_i32_9 = arith.constant 0 : i32
    %11 = arith.cmpi ne, %10, %c0_i32_9 : i32
    scf.if %11 {
      %c0_10 = arith.constant 0 : index
      %c0_11 = arith.constant 0 : index
      %12 = vector.load %arg7[%c0_10, %c0_11] : memref<16x256xf32, #tpu.memory_space<vmem>>, vector<16x256xf32>
      %c0_12 = arith.constant 0 : index
      %c0_13 = arith.constant 0 : index
      %13 = vector.load %arg5[%c0_12, %c0_13] : memref<1x256xf32, #tpu.memory_space<vmem>>, vector<1x256xf32>
      %14 = vector.broadcast %13 : vector<1x256xf32> to vector<16x256xf32>
      %15 = arith.addf %12, %14 : vector<16x256xf32>
      %c0_14 = arith.constant 0 : index
      %c0_15 = arith.constant 0 : index
      %16 = vector.load %arg6[%c0_14, %c0_15] : memref<16x256xf32, #tpu.memory_space<vmem>>, vector<16x256xf32>
      tpu.vector_store %arg6[%c0_14, %c0_15], %15 {strides = array<i32>} : memref<16x256xf32, #tpu.memory_space<vmem>>, vector<16x256xf32>,
    } else {
    }
    return
  }
  func.func @transform_0(%arg0: i32, %arg1: i32, %arg2: i32) -> (i32, i32) {
    %c0_i32 = arith.constant 0 : i32
    return %arg0, %arg2 : i32, i32
  }
  func.func @transform_1(%arg0: i32, %arg1: i32, %arg2: i32) -> (i32, i32) {
    %c0_i32 = arith.constant 0 : i32
    return %arg2, %arg1 : i32, i32
  }
  func.func @transform_2(%arg0: i32, %arg1: i32, %arg2: i32) -> (i32, i32) {
    %c0_i32 = arith.constant 0 : i32
    %c0_i32_0 = arith.constant 0 : i32
    return %c0_i32, %arg1 : i32, i32
  }
  func.func @transform_3(%arg0: i32, %arg1: i32, %arg2: i32) -> (i32, i32) {
    %c0_i32 = arith.constant 0 : i32
    return %arg0, %arg1 : i32, i32
  }
}

module attributes {stable_mosaic.version = 11 : i64} {
  func.func @_lstm_head_kernel(%arg0: i32, %arg1: memref<8x2x256xf32, #tpu.memory_space<vmem>>, %arg2: memref<64x256xf32, #tpu.memory_space<vmem>>, %arg3: memref<64x2xf32, #tpu.memory_space<vmem>>, %arg4: memref<1x2xf32, #tpu.memory_space<vmem>>, %arg5: memref<2x2xf32, #tpu.memory_space<vmem>>, %arg6: memref<2x64xf32, #tpu.memory_space<vmem>>, %arg7: memref<2x64xf32, #tpu.memory_space<vmem>>) attributes {dimension_semantics = [#tpu.dimension_semantics<parallel>], iteration_bounds = array<i64: 1>, scalar_prefetch = 0 : i64, scratch_operands = 2 : i64, tpu.core_type = #tpu.core_type<tc>, window_params = [{transform_indices = @transform_0, window_bounds = array<i64: 8, 2, 256>}, {pipeline_mode = #tpu.pipeline_mode<synchronous>, transform_indices = @transform_1, window_bounds = array<i64: 64, 256>}, {pipeline_mode = #tpu.pipeline_mode<synchronous>, transform_indices = @transform_2, window_bounds = array<i64: 64, 2>}, {pipeline_mode = #tpu.pipeline_mode<synchronous>, transform_indices = @transform_3, window_bounds = array<i64: 1, 2>}, {transform_indices = @transform_4, window_bounds = array<i64: 2, 2>}]} {
    %cst = arith.constant 0.000000e+00 : f32
    %0 = vector.broadcast %cst : f32 to vector<2x64xf32>
    %c0 = arith.constant 0 : index
    %c0_0 = arith.constant 0 : index
    %1 = vector.load %arg6[%c0, %c0_0] : memref<2x64xf32, #tpu.memory_space<vmem>>, vector<2x64xf32>
    tpu.vector_store %arg6[%c0, %c0_0], %0 {strides = array<i32>} : memref<2x64xf32, #tpu.memory_space<vmem>>, vector<2x64xf32>,
    %cst_1 = arith.constant 0.000000e+00 : f32
    %2 = vector.broadcast %cst_1 : f32 to vector<2x64xf32>
    %c0_2 = arith.constant 0 : index
    %c0_3 = arith.constant 0 : index
    %3 = vector.load %arg7[%c0_2, %c0_3] : memref<2x64xf32, #tpu.memory_space<vmem>>, vector<2x64xf32>
    tpu.vector_store %arg7[%c0_2, %c0_3], %2 {strides = array<i32>} : memref<2x64xf32, #tpu.memory_space<vmem>>, vector<2x64xf32>,
    %c0_4 = arith.constant 0 : index
    %c0_5 = arith.constant 0 : index
    %4 = vector.load %arg2[%c0_4, %c0_5] : memref<64x256xf32, #tpu.memory_space<vmem>>, vector<64x256xf32>
    %c0_i32 = arith.constant 0 : i32
    %c8_i32 = arith.constant 8 : i32
    %5 = arith.addi %c0_i32, %c8_i32 : i32
    %c1_i32 = arith.constant 1 : i32
    scf.for %arg8 = %c0_i32 to %5 step %c1_i32  : i32 {
      %13 = arith.index_cast %arg8 : i32 to index
      %c0_16 = arith.constant 0 : index
      %c0_17 = arith.constant 0 : index
      %14 = vector.load %arg1[%13, %c0_16, %c0_17] : memref<8x2x256xf32, #tpu.memory_space<vmem>>, vector<1x2x256xf32>
      %15 = vector.shape_cast %14 : vector<1x2x256xf32> to vector<2x256xf32>
      %c0_18 = arith.constant 0 : index
      %c0_19 = arith.constant 0 : index
      %16 = vector.load %arg6[%c0_18, %c0_19] : memref<2x64xf32, #tpu.memory_space<vmem>>, vector<2x64xf32>
      %c0_20 = arith.constant 0 : index
      %c0_21 = arith.constant 0 : index
      %17 = vector.load %arg7[%c0_20, %c0_21] : memref<2x64xf32, #tpu.memory_space<vmem>>, vector<2x64xf32>
      %cst_22 = arith.constant dense<0.000000e+00> : vector<2x256xf32>
      %18 = tpu.matmul %16, %4, %cst_22 {dimension_numbers = #tpu.dot_dimension_numbers<[1], [0], [0], [1], [0, 0, 1, 1], [], []>} : vector<2x64xf32>, vector<64x256xf32>, vector<2x256xf32> -> vector<2x256xf32>
      %19 = arith.addf %15, %18 : vector<2x256xf32>
      %20 = vector.extract_strided_slice %19 {offsets = [0, 0], sizes = [2, 64], strides = [1, 1]} : vector<2x256xf32> to vector<2x64xf32>
      %21 = arith.negf %20 : vector<2x64xf32>
      %22 = math.exp %21 : vector<2x64xf32>
      %cst_23 = arith.constant 1.000000e+00 : f32
      %23 = vector.broadcast %cst_23 : f32 to vector<2x64xf32>
      %24 = arith.addf %23, %22 : vector<2x64xf32>
      %25 = arith.divf %23, %24 : vector<2x64xf32>
      %26 = vector.extract_strided_slice %19 {offsets = [0, 64], sizes = [2, 64], strides = [1, 1]} : vector<2x256xf32> to vector<2x64xf32>
      %27 = arith.negf %26 : vector<2x64xf32>
      %28 = math.exp %27 : vector<2x64xf32>
      %cst_24 = arith.constant 1.000000e+00 : f32
      %29 = vector.broadcast %cst_24 : f32 to vector<2x64xf32>
      %30 = arith.addf %29, %28 : vector<2x64xf32>
      %31 = arith.divf %29, %30 : vector<2x64xf32>
      %32 = vector.extract_strided_slice %19 {offsets = [0, 128], sizes = [2, 64], strides = [1, 1]} : vector<2x256xf32> to vector<2x64xf32>
      %33 = math.tanh %32 : vector<2x64xf32>
      %34 = vector.extract_strided_slice %19 {offsets = [0, 192], sizes = [2, 64], strides = [1, 1]} : vector<2x256xf32> to vector<2x64xf32>
      %35 = arith.negf %34 : vector<2x64xf32>
      %36 = math.exp %35 : vector<2x64xf32>
      %cst_25 = arith.constant 1.000000e+00 : f32
      %37 = vector.broadcast %cst_25 : f32 to vector<2x64xf32>
      %38 = arith.addf %37, %36 : vector<2x64xf32>
      %39 = arith.divf %37, %38 : vector<2x64xf32>
      %40 = arith.mulf %31, %17 : vector<2x64xf32>
      %41 = arith.mulf %25, %33 : vector<2x64xf32>
      %42 = arith.addf %40, %41 : vector<2x64xf32>
      %43 = math.tanh %42 : vector<2x64xf32>
      %44 = arith.mulf %39, %43 : vector<2x64xf32>
      %c0_26 = arith.constant 0 : index
      %c0_27 = arith.constant 0 : index
      %45 = vector.load %arg6[%c0_26, %c0_27] : memref<2x64xf32, #tpu.memory_space<vmem>>, vector<2x64xf32>
      tpu.vector_store %arg6[%c0_26, %c0_27], %44 {strides = array<i32>} : memref<2x64xf32, #tpu.memory_space<vmem>>, vector<2x64xf32>,
      %c0_28 = arith.constant 0 : index
      %c0_29 = arith.constant 0 : index
      %46 = vector.load %arg7[%c0_28, %c0_29] : memref<2x64xf32, #tpu.memory_space<vmem>>, vector<2x64xf32>
      tpu.vector_store %arg7[%c0_28, %c0_29], %42 {strides = array<i32>} : memref<2x64xf32, #tpu.memory_space<vmem>>, vector<2x64xf32>,
    }
    %c8_i32_6 = arith.constant 8 : i32
    %c0_7 = arith.constant 0 : index
    %c0_8 = arith.constant 0 : index
    %6 = vector.load %arg6[%c0_7, %c0_8] : memref<2x64xf32, #tpu.memory_space<vmem>>, vector<2x64xf32>
    %c0_9 = arith.constant 0 : index
    %c0_10 = arith.constant 0 : index
    %7 = vector.load %arg3[%c0_9, %c0_10] : memref<64x2xf32, #tpu.memory_space<vmem>>, vector<64x2xf32>
    %cst_11 = arith.constant dense<0.000000e+00> : vector<2x2xf32>
    %8 = tpu.matmul %6, %7, %cst_11 {dimension_numbers = #tpu.dot_dimension_numbers<[1], [0], [0], [1], [0, 0, 1, 1], [], []>} : vector<2x64xf32>, vector<64x2xf32>, vector<2x2xf32> -> vector<2x2xf32>
    %c0_12 = arith.constant 0 : index
    %c0_13 = arith.constant 0 : index
    %9 = vector.load %arg4[%c0_12, %c0_13] : memref<1x2xf32, #tpu.memory_space<vmem>>, vector<1x2xf32>
    %10 = vector.broadcast %9 : vector<1x2xf32> to vector<2x2xf32>
    %11 = arith.addf %8, %10 : vector<2x2xf32>
    %c0_14 = arith.constant 0 : index
    %c0_15 = arith.constant 0 : index
    %12 = vector.load %arg5[%c0_14, %c0_15] : memref<2x2xf32, #tpu.memory_space<vmem>>, vector<2x2xf32>
    tpu.vector_store %arg5[%c0_14, %c0_15], %11 {strides = array<i32>} : memref<2x2xf32, #tpu.memory_space<vmem>>, vector<2x2xf32>,
    return
  }
  func.func @transform_0(%arg0: i32) -> (i32, i32, i32) {
    %c0_i32 = arith.constant 0 : i32
    %c0_i32_0 = arith.constant 0 : i32
    %c0_i32_1 = arith.constant 0 : i32
    return %c0_i32, %arg0, %c0_i32_0 : i32, i32, i32
  }
  func.func @transform_1(%arg0: i32) -> (i32, i32) {
    %c0_i32 = arith.constant 0 : i32
    %c0_i32_0 = arith.constant 0 : i32
    %c0_i32_1 = arith.constant 0 : i32
    return %c0_i32, %c0_i32_0 : i32, i32
  }
  func.func @transform_2(%arg0: i32) -> (i32, i32) {
    %c0_i32 = arith.constant 0 : i32
    %c0_i32_0 = arith.constant 0 : i32
    %c0_i32_1 = arith.constant 0 : i32
    return %c0_i32, %c0_i32_0 : i32, i32
  }
  func.func @transform_3(%arg0: i32) -> (i32, i32) {
    %c0_i32 = arith.constant 0 : i32
    %c0_i32_0 = arith.constant 0 : i32
    %c0_i32_1 = arith.constant 0 : i32
    return %c0_i32, %c0_i32_0 : i32, i32
  }
  func.func @transform_4(%arg0: i32) -> (i32, i32) {
    %c0_i32 = arith.constant 0 : i32
    %c0_i32_0 = arith.constant 0 : i32
    return %arg0, %c0_i32 : i32, i32
  }
}

module attributes {stable_mosaic.version = 11 : i64} {
  func.func @_lstm_seq_kernel(%arg0: i32, %arg1: memref<8x2x256xf32, #tpu.memory_space<vmem>>, %arg2: memref<64x256xf32, #tpu.memory_space<vmem>>, %arg3: memref<8x2x64xf32, #tpu.memory_space<vmem>>, %arg4: memref<2x64xf32, #tpu.memory_space<vmem>>, %arg5: memref<2x64xf32, #tpu.memory_space<vmem>>) attributes {dimension_semantics = [#tpu.dimension_semantics<parallel>], iteration_bounds = array<i64: 1>, scalar_prefetch = 0 : i64, scratch_operands = 2 : i64, tpu.core_type = #tpu.core_type<tc>, window_params = [{transform_indices = @transform_0, window_bounds = array<i64: 8, 2, 256>}, {pipeline_mode = #tpu.pipeline_mode<synchronous>, transform_indices = @transform_1, window_bounds = array<i64: 64, 256>}, {transform_indices = @transform_2, window_bounds = array<i64: 8, 2, 64>}]} {
    %cst = arith.constant 0.000000e+00 : f32
    %0 = vector.broadcast %cst : f32 to vector<2x64xf32>
    %c0 = arith.constant 0 : index
    %c0_0 = arith.constant 0 : index
    %1 = vector.load %arg4[%c0, %c0_0] : memref<2x64xf32, #tpu.memory_space<vmem>>, vector<2x64xf32>
    tpu.vector_store %arg4[%c0, %c0_0], %0 {strides = array<i32>} : memref<2x64xf32, #tpu.memory_space<vmem>>, vector<2x64xf32>,
    %cst_1 = arith.constant 0.000000e+00 : f32
    %2 = vector.broadcast %cst_1 : f32 to vector<2x64xf32>
    %c0_2 = arith.constant 0 : index
    %c0_3 = arith.constant 0 : index
    %3 = vector.load %arg5[%c0_2, %c0_3] : memref<2x64xf32, #tpu.memory_space<vmem>>, vector<2x64xf32>
    tpu.vector_store %arg5[%c0_2, %c0_3], %2 {strides = array<i32>} : memref<2x64xf32, #tpu.memory_space<vmem>>, vector<2x64xf32>,
    %c0_4 = arith.constant 0 : index
    %c0_5 = arith.constant 0 : index
    %4 = vector.load %arg2[%c0_4, %c0_5] : memref<64x256xf32, #tpu.memory_space<vmem>>, vector<64x256xf32>
    %c0_i32 = arith.constant 0 : i32
    %c8_i32 = arith.constant 8 : i32
    %5 = arith.addi %c0_i32, %c8_i32 : i32
    %c1_i32 = arith.constant 1 : i32
    scf.for %arg6 = %c0_i32 to %5 step %c1_i32  : i32 {
      %6 = arith.index_cast %arg6 : i32 to index
      %c0_7 = arith.constant 0 : index
      %c0_8 = arith.constant 0 : index
      %7 = vector.load %arg1[%6, %c0_7, %c0_8] : memref<8x2x256xf32, #tpu.memory_space<vmem>>, vector<1x2x256xf32>
      %8 = vector.shape_cast %7 : vector<1x2x256xf32> to vector<2x256xf32>
      %c0_9 = arith.constant 0 : index
      %c0_10 = arith.constant 0 : index
      %9 = vector.load %arg4[%c0_9, %c0_10] : memref<2x64xf32, #tpu.memory_space<vmem>>, vector<2x64xf32>
      %c0_11 = arith.constant 0 : index
      %c0_12 = arith.constant 0 : index
      %10 = vector.load %arg5[%c0_11, %c0_12] : memref<2x64xf32, #tpu.memory_space<vmem>>, vector<2x64xf32>
      %cst_13 = arith.constant dense<0.000000e+00> : vector<2x256xf32>
      %11 = tpu.matmul %9, %4, %cst_13 {dimension_numbers = #tpu.dot_dimension_numbers<[1], [0], [0], [1], [0, 0, 1, 1], [], []>} : vector<2x64xf32>, vector<64x256xf32>, vector<2x256xf32> -> vector<2x256xf32>
      %12 = arith.addf %8, %11 : vector<2x256xf32>
      %13 = vector.extract_strided_slice %12 {offsets = [0, 0], sizes = [2, 64], strides = [1, 1]} : vector<2x256xf32> to vector<2x64xf32>
      %14 = arith.negf %13 : vector<2x64xf32>
      %15 = math.exp %14 : vector<2x64xf32>
      %cst_14 = arith.constant 1.000000e+00 : f32
      %16 = vector.broadcast %cst_14 : f32 to vector<2x64xf32>
      %17 = arith.addf %16, %15 : vector<2x64xf32>
      %18 = arith.divf %16, %17 : vector<2x64xf32>
      %19 = vector.extract_strided_slice %12 {offsets = [0, 64], sizes = [2, 64], strides = [1, 1]} : vector<2x256xf32> to vector<2x64xf32>
      %20 = arith.negf %19 : vector<2x64xf32>
      %21 = math.exp %20 : vector<2x64xf32>
      %cst_15 = arith.constant 1.000000e+00 : f32
      %22 = vector.broadcast %cst_15 : f32 to vector<2x64xf32>
      %23 = arith.addf %22, %21 : vector<2x64xf32>
      %24 = arith.divf %22, %23 : vector<2x64xf32>
      %25 = vector.extract_strided_slice %12 {offsets = [0, 128], sizes = [2, 64], strides = [1, 1]} : vector<2x256xf32> to vector<2x64xf32>
      %26 = math.tanh %25 : vector<2x64xf32>
      %27 = vector.extract_strided_slice %12 {offsets = [0, 192], sizes = [2, 64], strides = [1, 1]} : vector<2x256xf32> to vector<2x64xf32>
      %28 = arith.negf %27 : vector<2x64xf32>
      %29 = math.exp %28 : vector<2x64xf32>
      %cst_16 = arith.constant 1.000000e+00 : f32
      %30 = vector.broadcast %cst_16 : f32 to vector<2x64xf32>
      %31 = arith.addf %30, %29 : vector<2x64xf32>
      %32 = arith.divf %30, %31 : vector<2x64xf32>
      %33 = arith.mulf %24, %10 : vector<2x64xf32>
      %34 = arith.mulf %18, %26 : vector<2x64xf32>
      %35 = arith.addf %33, %34 : vector<2x64xf32>
      %36 = math.tanh %35 : vector<2x64xf32>
      %37 = arith.mulf %32, %36 : vector<2x64xf32>
      %c0_17 = arith.constant 0 : index
      %c0_18 = arith.constant 0 : index
      %38 = vector.load %arg4[%c0_17, %c0_18] : memref<2x64xf32, #tpu.memory_space<vmem>>, vector<2x64xf32>
      tpu.vector_store %arg4[%c0_17, %c0_18], %37 {strides = array<i32>} : memref<2x64xf32, #tpu.memory_space<vmem>>, vector<2x64xf32>,
      %c0_19 = arith.constant 0 : index
      %c0_20 = arith.constant 0 : index
      %39 = vector.load %arg5[%c0_19, %c0_20] : memref<2x64xf32, #tpu.memory_space<vmem>>, vector<2x64xf32>
      tpu.vector_store %arg5[%c0_19, %c0_20], %35 {strides = array<i32>} : memref<2x64xf32, #tpu.memory_space<vmem>>, vector<2x64xf32>,
      %40 = arith.index_cast %arg6 : i32 to index
      %c0_21 = arith.constant 0 : index
      %c0_22 = arith.constant 0 : index
      %41 = vector.load %arg3[%40, %c0_21, %c0_22] : memref<8x2x64xf32, #tpu.memory_space<vmem>>, vector<1x2x64xf32>
      %42 = vector.shape_cast %41 : vector<1x2x64xf32> to vector<2x64xf32>
      %43 = vector.shape_cast %37 : vector<2x64xf32> to vector<1x2x64xf32>
      tpu.vector_store %arg3[%40, %c0_21, %c0_22], %43 {strides = array<i32>} : memref<8x2x64xf32, #tpu.memory_space<vmem>>, vector<1x2x64xf32>,
    }
    %c8_i32_6 = arith.constant 8 : i32
    return
  }
  func.func @transform_0(%arg0: i32) -> (i32, i32, i32) {
    %c0_i32 = arith.constant 0 : i32
    %c0_i32_0 = arith.constant 0 : i32
    %c0_i32_1 = arith.constant 0 : i32
    return %c0_i32, %arg0, %c0_i32_0 : i32, i32, i32
  }
  func.func @transform_1(%arg0: i32) -> (i32, i32) {
    %c0_i32 = arith.constant 0 : i32
    %c0_i32_0 = arith.constant 0 : i32
    %c0_i32_1 = arith.constant 0 : i32
    return %c0_i32, %c0_i32_0 : i32, i32
  }
  func.func @transform_2(%arg0: i32) -> (i32, i32, i32) {
    %c0_i32 = arith.constant 0 : i32
    %c0_i32_0 = arith.constant 0 : i32
    %c0_i32_1 = arith.constant 0 : i32
    return %c0_i32, %arg0, %c0_i32_0 : i32, i32, i32
  }
}

</mosaic_0001>

<bundles_post_ra>
// kernel: sentiment_forward.7
= control target key start
LH: loop header
LB: loop body
LE: loop exit
PB: predicated region body
PF: predicated region fallthrough
CT: control target
= control target key end

     0   :  { %9 = vsyncpa [#allocation5], 0  ;;  %vm18_vm0 = vcmask 517120   ;;  %v430_v2 = vmov 0.0   ;;  %s546_s21 = smov 0   ;;  %s623_s0 = inlined_call_operand.vmem [shape: f32[8,2,256], index: 0, kind: input, shape index: {}]   ;;  %s624_s1 = inlined_call_operand.vmem [shape: f32[64,256], index: 1, kind: input, shape index: {}]   ;;  %s625_s2 = inlined_call_operand.vmem [shape: f32[64,2], index: 2, kind: input, shape index: {}]   ;;  %s626_s3 = inlined_call_operand.vmem [shape: f32[1,2], index: 3, kind: input, shape index: {}]   ;;  %s627_s4 = inlined_call_operand.hbm [shape: f32[2,2], index: 4, kind: output, shape index: {}]  }
   0x1   :  { %v465_v0 = vld [vmem:[%s624_s1] sm:$0xff]  ;;  %v470_v1 = vld [vmem:[%s624_s1 + $0x8] sm:$0xff]  ;;  %19 = vst.msk [vmem:[#allocation2] sm:$0x3] %vm18_vm0, %v430_v2  ;;  %20 = vst.msk [vmem:[#allocation3] sm:$0x3] %vm18_vm0, %v430_v2 }
   0x2   :  { %v479_v3 = vld [vmem:[%s624_s1 + $0x10] sm:$0xff]  ;;  %v484_v4 = vld [vmem:[%s624_s1 + $0x18] sm:$0xff]  ;;  %v489_v5 = vld [vmem:[%s624_s1 + $0x20] sm:$0xff] }
   0x3   :  { %v494_v6 = vld [vmem:[%s624_s1 + $0x28] sm:$0xff]  ;;  %v499_v7 = vld [vmem:[%s624_s1 + $0x30] sm:$0xff]  ;;  %v504_v8 = vld [vmem:[%s624_s1 + $0x38] sm:$0xff] }
   0x4   :  { %v509_v9 = vld [vmem:[%s624_s1 + $0x40] sm:$0xff]  ;;  %v514_v10 = vld [vmem:[%s624_s1 + $0x48] sm:$0xff]  ;;  %v519_v11 = vld [vmem:[%s624_s1 + $0x50] sm:$0xff] }
   0x5   :  { %v524_v12 = vld [vmem:[%s624_s1 + $0x58] sm:$0xff]  ;;  %v529_v13 = vld [vmem:[%s624_s1 + $0x60] sm:$0xff]  ;;  %v534_v14 = vld [vmem:[%s624_s1 + $0x68] sm:$0xff] }
   0x6   :  { %v539_v15 = vld [vmem:[%s624_s1 + $0x70] sm:$0xff]  ;;  %v544_v16 = vld [vmem:[%s624_s1 + $0x78] sm:$0xff] }
   0x7 LB: > { %v343_v17 = vpack.c.bf16 %v484_v4, %v470_v1  ;;  %v345_v18 = vpack.c.bf16 %v479_v3, %v465_v0  ;;  %v347_v19 = vpack.c.bf16 %v504_v8, %v494_v6  ;;  %s431_s1 = smov 64   ;;  %v349_v21 = vpack.c.bf16 %v499_v7, %v489_v5  ;;  %s314_s22 = sshll.u32 %s428_s21, 2  ;;  %s428_s21 = sphi %s546_s21, %s42_s21  }
   0x8   : > { %v311_v20 = vld.sshfl [vmem:[#allocation3] sm:$0x3 pattern:$0x76325410]  ;;  %v432_v22 = vmov 0.0   ;;  %v351_v23 = vpack.c.bf16 %v524_v12, %v514_v10  ;;  %v353_v24 = vpack.c.bf16 %v519_v11, %v509_v9  ;;  %v355_v25 = vpack.c.bf16 %v544_v16, %v534_v14  ;;  %s45_s25 = scalar_lea.vmem %s623_s0, %s314_s22  ;;  %s42_s21 = sadd.s32 1, %s428_s21  }
   0x9   : > { %344 = vmatprep.subr.bf16.mxu0 %v343_v17  ;;  %164 = vrot.lane.b32.xlu0 %v311_v20, %s431_s1  ;;  %v357_v26 = vpack.c.bf16 %v539_v15, %v529_v13  ;;  %v47_v27 = vld [vmem:[#allocation2] sm:$0x3]  ;;  %vm49_vm1 = vcmask 523264   ;;  %v433_v28 = vmov 1983009808   ;;  %v130_v30 = vlaneseq  ;;  %p39_p0 = scmp.ge.s32.totalorder %s42_s21, 8  }
   0xa   : > { %346 = vmatpush1.bf16.msra.mxu0 %v345_v18  ;;  %117 = vmatprep.mubr.f32.mxu0 %v432_v22  ;;  %v128_v29 = vunpack.c.l.s4 %v433_v28  ;;  %v46_v37 = vld [vmem:[%s45_s25] sm:$0xf]  ;;  %v195_v63 = vld [vmem:[%s625_s2 + $0x8] sm:$0xff] (%p39_p0)  ;;  %v196_v17 = vld [vmem:[%s625_s2 + $0x10] sm:$0xff] (%p39_p0)  ;;  %v434_v18 = vmov (%p39_p0), 0.0|0.0   ;;  %vm435_vm2 = vmmov (%p39_p0), 0  }
   0xb   : > { %348 = vmatprep.subr.bf16.mxu0 %v347_v19  ;;  %v131_v32 = vshrl.u32 %v130_v30, 7  ;;  %v194_v62 = vld [vmem:[%s625_s2] sm:$0xff] (%p39_p0)  ;;  %v197_v20 = vld [vmem:[%s625_s2 + $0x18] sm:$0xff] (%p39_p0)  ;;  %v199_v3 = vld [vmem:[%s625_s2 + $0x28] sm:$0xff] (%p39_p0)  ;;  %s436_s17 = smov (%p39_p0), [#allocation4]   ;;  %vm283_vm3 = vcmask (%p39_p0), 9216  }
   0xc   : > { %v129_v31 = vunpack.c.0.s8 %v128_v29  ;;  %v360_v19 = vpack.c.bf16 (%p39_p0), %v195_v63, %v194_v62  ;;  %v363_v0 = vpack.c.bf16 (%p39_p0), %v197_v20, %v196_v17  ;;  %v198_v1 = vld [vmem:[%s625_s2 + $0x20] sm:$0xff] (%p39_p0)  ;;  %v200_v5 = vld [vmem:[%s625_s2 + $0x30] sm:$0xff] (%p39_p0)  ;;  %s291_s18 = sshll.u32 (%p39_p0), %s436_s17, 4  ;;  %s292_s18 = int_to_ptr.vmem [resolvable:$true] %s291_s18 }
   0xd   :  { %v366_v4 = vpack.c.bf16 (%p39_p0), %v199_v3, %v198_v1  ;;  %v312_v8 = vld [vmem:[%s626_s3] ss:$0 sm:$0xff] (%p39_p0)  ;;  %p403_p2 = scmp.lt.s32.totalorder (%p39_p0), %s292_s18, %s292_s18 }
   0xe   : > { %350 = vmatpush1.bf16.msra.mxu0 %v349_v21  ;;  %v132_v34 = vsub.s32 %v129_v31, %v131_v32 }
   0xf   : > { %352 = vmatprep.subr.bf16.mxu0 %v351_v23 }
  0x12   : > { %354 = vmatpush1.bf16.msra.mxu0 %v353_v24 }
  0x13   : > { %356 = vmatprep.subr.bf16.mxu0 %v355_v25 }
  0x16   : > { %358 = vmatpush1.bf16.msra.mxu0 %v357_v26 }
  0x17   :  { %359 = vmatprep.subr.bf16.mxu0 (%p39_p0), %v434_v18 }
  0x19   : > { %308 = vmatmul.mubr.msk.f32.vlgmr.msra.gmra.mrb[0].mxu0 %vm49_vm1, %v47_v27 }
  0x1a   :  { %340 = vmatprep.mubr.msk.f32.mxu0 (%p39_p0), %vm435_vm2, %v430_v2  ;;  %361 = vmatpush3.bf16.msra.mxu0 (%p39_p0), %v360_v19  ;;  %v201_v2 = vld [vmem:[%s625_s2 + $0x38] sm:$0xff] (%p39_p0)  ;;  %s398_s2 = scalar_lea.vmem (%p39_p0), %s292_s18, 32 }
  0x1b   :  { %362 = vmatprep.subr.bf16.mxu0 (%p39_p0), %v434_v18  ;;  %v369_v6 = vpack.c.bf16 (%p39_p0), %v201_v2, %v200_v5  ;;  %p399_p1 = scmp.ne.s32.totalorder (%p39_p0), %s292_s18, %s398_s2  ;;  %p404_p3 = scmp.lt.s32.totalorder (%p39_p0), %s398_s2, %s398_s2 }
  0x1d   :  { %p405_p4 = por (%p39_p0), %p404_p3, %p403_p2 }
  0x1e   :  { %364 = vmatpush3.bf16.msra.mxu0 (%p39_p0), %v363_v0 }
  0x1f   :  { %365 = vmatprep.subr.bf16.mxu0 (%p39_p0), %v434_v18  ;;  %p406_p5 = pnand (%p39_p0), %p405_p4, %p399_p1 }
  0x22   :  { %367 = vmatpush3.bf16.msra.mxu0 (%p39_p0), %v366_v4 }
  0x23   :  { %368 = vmatprep.subr.bf16.mxu0 (%p39_p0), %v434_v18 }
  0x26   :  { %370 = vmatpush3.bf16.msra.mxu0 (%p39_p0), %v369_v6 }
  0x7b   : > { %v165_v47 = vpop.permute.xlu0 %164 }
  0xec   : > { %v119_v33 = vpop.f32.mrb[0].mxu0 }
  0xed   : > { %v121_v35 = vpop.f32.mrb[1].mxu0 }
  0xee   : > { %v126_v36 = vcombine.low %v119_v33, %v121_v35 }
  0xf0   : > { %v133_v38 = vrot.slane %v126_v36, %v132_v34 }
  0xf2   : > { %v135_v39 = vadd.f32 %v133_v38, %v46_v37 }
  0xf4   : > { %146 = vrot.lane.b32.xlu1 %v135_v39, %s431_s1  ;;  %v309_v40 = vmul.f32 -1.442695, %v135_v39  ;;  %v143_v41 = vrot.slane %v135_v39, 2 }
  0xf6   : > { %386 = vpow2.f32 %v309_v40 }
  0xf7   : > { %388 = vtanh.f32 %v143_v41 }
 0x100   : > { %v387_v42 = vpop.eup %386 }
 0x101   : > { %v139_v43 = vadd.f32 1.0, %v387_v42  ;;  %v389_v44 = vpop.eup %388 }
 0x103   : > { %390 = vrcp.f32 %v139_v43 }
 0x10d   : > { %v391_v45 = vpop.eup %390 }
 0x10e   : > { %v168_v46 = vmul.f32 %v391_v45, %v389_v44  ;;  %v167_v48 = vmul.f32 %v391_v45, %v165_v47 }
 0x110   : > { %170 = vrot.lane.b32.xlu0 %v168_v46, %s431_s1 }
 0x166   : > { %v147_v53 = vpop.permute.xlu1 %146 }
 0x167   : > { %v148_v54 = vrot.slane %v147_v53, 2 }
 0x169   : > { %v310_v55 = vmul.f32 -1.442695, %v148_v54 }
 0x182   : > { %v171_v49 = vpop.permute.xlu0 %170 }
 0x183   : > { %v173_v50 = vadd.f32 %v171_v49, %v167_v48 }
 0x185   : > { %392 = vtanh.f32 %v173_v50  ;;  %v188_v51 = vrot.slane %v173_v50, %v132_v34 }
 0x186   : > { %394 = vpow2.f32 %v310_v55 }
 0x187   : > { %189 = vrot.lane.b32.xlu0 %v188_v51, %s431_s1 }
 0x18f   : > { %v393_v52 = vpop.eup %392 }
 0x190   : > { %176 = vrot.lane.b32.xlu1 %v393_v52, %s431_s1  ;;  %v395_v56 = vpop.eup %394 }
 0x191   : > { %v153_v57 = vadd.f32 1.0, %v395_v56 }
 0x193   : > { %396 = vrcp.f32 %v153_v57 }
 0x19d   : > { %v397_v59 = vpop.eup %396 }
 0x1f9   : > { %v190_v58 = vpop.permute.xlu0 %189 }
 0x1fa   : > { %192 = vst.msk [vmem:[#allocation3] sm:$0x3] %vm18_vm0, %v190_v58 }
 0x1ff   :  { %41 = sbr.rel (!%p39_p0) target bundleno = 7 (0x7), region = 44 }
 0x202   : > { %v177_v60 = vpop.permute.xlu1 %176 }
 0x203   : > { %v179_v61 = vmul.f32 %v397_v59, %v177_v60 }
 0x205   : > { %180 = vst.msk [vmem:[#allocation2] sm:$0x3] %vm18_vm0, %v179_v61 }
 0x20c   :  { %v193_v7 = vld [vmem:[#allocation2] sm:$0x3] }
 0x20d   :  { %341 = vmatmul.mubr.msk.f32.vlgmr.msra.gmra.mrb[0].mxu0 %vm49_vm1, %v193_v7 }
 0x2e0   :  { %v279_v9 = vpop.f32.mrb[0].mxu0 }
 0x2e1   :  { %v280_v10 = vadd.f32 %v312_v8, %v279_v9  ;;  %v342_v11 = vpop.f32.mrb[1].mxu0 }
 0x2e3   :  { %284 = vst.msk [vmem:[#allocation4] sm:$0x3] %vm283_vm3, %v280_v10 }
 0x2e4   :  { %409 = shalt.err (!%p406_p5)
}
 0x2e5   :  { %s410_s21 = scalar_lea.hbm %s627_s4, 32 }
 0x2e6   :  { %p411_p6 = scmp.ne.s32.totalorder %s627_s4, %s410_s21  ;;  %p414_p7 = scmp.lt.u32.totalorder %s410_s21, %s627_s4 }
 0x2e8   :  { %p416_p8 = pnand %p414_p7, %p411_p6 }
 0x2ea   :  { %419 = shalt.err (!%p416_p8)
}
 0x2eb   :  { %294 = dma.vmem_to_hbm [thread:$0]  %s292_s18, 32, %s627_s4, [#allocation5]  }
 0x2ec   :  { %424 = dma.done.wait [#allocation5], 32  }
 0x2ed   :  { %425 = vsyncadd [#allocation5], 4294967264 }
 0x2ee   :  { %298 = vsyncpa [#allocation5], 1 }

// kernel: sentiment_forward.4
= control target key start
LH: loop header
LB: loop body
LE: loop exit
PB: predicated region body
PF: predicated region fallthrough
CT: control target
= control target key end

     0   :  { %v194_v3 = vmov 0.0   ;;  %vm44_vm0 = vcmask 523264   ;;  %v145_v27 = vlaneseq  ;;  %s284_s1 = inlined_call_operand.vmem [shape: f32[64,256], index: 1, kind: input, shape index: {}]   ;;  %s285_s0 = inlined_call_operand.vmem [shape: f32[16,64], index: 0, kind: input, shape index: {}]   ;;  %s286_s2 = inlined_call_operand.vmem [shape: f32[1,256], index: 2, kind: input, shape index: {}]   ;;  %s287_s3 = inlined_call_operand.vmem [shape: f32[16,256], index: 3, kind: output, shape index: {}]  }
   0x1   :  { %v29_v0 = vld [vmem:[%s284_s1 + $0x8] sm:$0xff]  ;;  %v31_v1 = vld [vmem:[%s284_s1 + $0x18] sm:$0xff]  ;;  %v28_v2 = vld [vmem:[%s284_s1] sm:$0xff]  ;;  %115 = vmatprep.mubr.f32.mxu0 %v194_v3  ;;  %121 = vmatprep.mubr.f32.mxu1 %v194_v3 }
   0x2   :  { %v169_v4 = vpack.c.bf16 %v31_v1, %v29_v0  ;;  %v30_v5 = vld [vmem:[%s284_s1 + $0x10] sm:$0xff]  ;;  %v33_v6 = vld [vmem:[%s284_s1 + $0x28] sm:$0xff]  ;;  %v35_v7 = vld [vmem:[%s284_s1 + $0x38] sm:$0xff]  ;;  %v146_v28 = vshrl.u32 %v145_v27, 7 }
   0x3   :  { %v171_v8 = vpack.c.bf16 %v30_v5, %v28_v2  ;;  %v173_v9 = vpack.c.bf16 %v35_v7, %v33_v6  ;;  %v32_v10 = vld [vmem:[%s284_s1 + $0x20] sm:$0xff]  ;;  %v34_v11 = vld [vmem:[%s284_s1 + $0x30] sm:$0xff]  ;;  %v37_v12 = vld [vmem:[%s284_s1 + $0x48] sm:$0xff] }
   0x4   :  { %170 = vmatprep.subr.bf16.mxu0 %v169_v4  ;;  %185 = vmatprep.subr.bf16.mxu1 %v169_v4  ;;  %v39_v13 = vld [vmem:[%s284_s1 + $0x58] sm:$0xff]  ;;  %v175_v14 = vpack.c.bf16 %v34_v11, %v32_v10  ;;  %v36_v16 = vld [vmem:[%s284_s1 + $0x40] sm:$0xff]  ;;  %v38_v17 = vld [vmem:[%s284_s1 + $0x50] sm:$0xff]  ;;  %v147_v29 = vsub.s32 0, %v146_v28  ;;  %v151_v31 = vsub.s32 1, %v146_v28 }
   0x5   :  { %172 = vmatpush1.bf16.msra.mxu0 %v171_v8  ;;  %189 = vmatpush1.bf16.msra.mxu1 %v171_v8  ;;  %v177_v15 = vpack.c.bf16 %v39_v13, %v37_v12  ;;  %v41_v18 = vld [vmem:[%s284_s1 + $0x68] sm:$0xff]  ;;  %v43_v19 = vld [vmem:[%s284_s1 + $0x78] sm:$0xff]  ;;  %v179_v20 = vpack.c.bf16 %v38_v17, %v36_v16  ;;  %v40_v22 = vld [vmem:[%s284_s1 + $0x60] sm:$0xff] }
   0x6   :  { %174 = vmatprep.subr.bf16.mxu0 %v173_v9  ;;  %186 = vmatprep.subr.bf16.mxu1 %v173_v9  ;;  %v181_v21 = vpack.c.bf16 %v43_v19, %v41_v18  ;;  %v42_v23 = vld [vmem:[%s284_s1 + $0x70] sm:$0xff]  ;;  %v26_v25 = vld [vmem:[%s285_s0] sm:$0xff]  ;;  %v27_v26 = vld [vmem:[%s285_s0 + $0x8] sm:$0xff] }
   0x7   :  { %v183_v24 = vpack.c.bf16 %v42_v23, %v40_v22  ;;  %v143_v30 = vld [vmem:[%s286_s2] sm:$0x3] }
   0x8   :  { %v148_v32 = vrot.slane %v143_v30, %v147_v29  ;;  %v152_v33 = vrot.slane %v143_v30, %v151_v31 }
   0x9   :  { %176 = vmatpush1.bf16.msra.mxu0 %v175_v14  ;;  %190 = vmatpush1.bf16.msra.mxu1 %v175_v14 }
   0xa   :  { %178 = vmatprep.subr.bf16.mxu0 %v177_v15  ;;  %187 = vmatprep.subr.bf16.mxu1 %v177_v15 }
   0xd   :  { %180 = vmatpush1.bf16.msra.mxu0 %v179_v20  ;;  %191 = vmatpush1.bf16.msra.mxu1 %v179_v20 }
   0xe   :  { %182 = vmatprep.subr.bf16.mxu0 %v181_v21  ;;  %188 = vmatprep.subr.bf16.mxu1 %v181_v21 }
  0x11   :  { %184 = vmatpush1.bf16.msra.mxu0 %v183_v24  ;;  %192 = vmatpush1.bf16.msra.mxu1 %v183_v24 }
  0x14   :  { %167 = vmatmul.mubr.msk.f32.vlgmr.msra.gmra.mrb[0].mxu0 %vm44_vm0, %v26_v25  ;;  %168 = vmatmul.mubr.msk.f32.vlgmr.msra.gmra.mrb[0].mxu1 %vm44_vm0, %v27_v26 }
  0xe7   :  { %v117_v34 = vpop.f32.mrb[0].mxu0  ;;  %v123_v35 = vpop.f32.mrb[0].mxu1 }
  0xe8   :  { %v155_v36 = vadd.f32 %v148_v32, %v117_v34  ;;  %v157_v37 = vadd.f32 %v148_v32, %v123_v35  ;;  %v119_v38 = vpop.f32.mrb[1].mxu0  ;;  %v125_v39 = vpop.f32.mrb[1].mxu1 }
  0xe9   :  { %v156_v40 = vadd.f32 %v152_v33, %v119_v38  ;;  %v158_v41 = vadd.f32 %v152_v33, %v125_v39 }
  0xea   :  { %159 = vst [vmem:[%s287_s3] sm:$0xff] %v155_v36  ;;  %161 = vst [vmem:[%s287_s3 + $0x10] sm:$0xff] %v157_v37 }
  0xeb   :  { %160 = vst [vmem:[%s287_s3 + $0x8] sm:$0xff] %v156_v40  ;;  %162 = vst [vmem:[%s287_s3 + $0x18] sm:$0xff] %v158_v41 }

// kernel: sentiment_forward.5
= control target key start
LH: loop header
LB: loop body
LE: loop exit
PB: predicated region body
PF: predicated region fallthrough
CT: control target
= control target key end

     0   :  { %vm11_vm0 = vcmask 517120   ;;  %v256_v0 = vmov 0.0   ;;  %s357_s13 = smov 0   ;;  %s397_s0 = inlined_call_operand.vmem [shape: f32[8,2,256], index: 0, kind: input, shape index: {}]   ;;  %s398_s1 = inlined_call_operand.vmem [shape: f32[64,256], index: 1, kind: input, shape index: {}]   ;;  %s399_s2 = inlined_call_operand.vmem [shape: f32[8,2,64], index: 2, kind: output, shape index: {}]  }
   0x1   :  { %12 = vst.msk [vmem:[#allocation2] sm:$0x3] %vm11_vm0, %v256_v0  ;;  %13 = vst.msk [vmem:[#allocation3] sm:$0x3] %vm11_vm0, %v256_v0  ;;  %v280_v1 = vld [vmem:[%s398_s1] sm:$0xff]  ;;  %v285_v2 = vld [vmem:[%s398_s1 + $0x8] sm:$0xff] }
   0x2   :  { %v290_v3 = vld [vmem:[%s398_s1 + $0x10] sm:$0xff]  ;;  %v295_v4 = vld [vmem:[%s398_s1 + $0x18] sm:$0xff]  ;;  %v300_v5 = vld [vmem:[%s398_s1 + $0x20] sm:$0xff] }
   0x3   :  { %v305_v6 = vld [vmem:[%s398_s1 + $0x28] sm:$0xff]  ;;  %v310_v7 = vld [vmem:[%s398_s1 + $0x30] sm:$0xff]  ;;  %v315_v8 = vld [vmem:[%s398_s1 + $0x38] sm:$0xff] }
   0x4   :  { %v320_v9 = vld [vmem:[%s398_s1 + $0x40] sm:$0xff]  ;;  %v325_v10 = vld [vmem:[%s398_s1 + $0x48] sm:$0xff]  ;;  %v330_v11 = vld [vmem:[%s398_s1 + $0x50] sm:$0xff] }
   0x5   :  { %v335_v12 = vld [vmem:[%s398_s1 + $0x58] sm:$0xff]  ;;  %v340_v13 = vld [vmem:[%s398_s1 + $0x60] sm:$0xff]  ;;  %v345_v14 = vld [vmem:[%s398_s1 + $0x68] sm:$0xff] }
   0x6   :  { %v350_v15 = vld [vmem:[%s398_s1 + $0x70] sm:$0xff]  ;;  %v355_v16 = vld [vmem:[%s398_s1 + $0x78] sm:$0xff] }
   0x7 LB: > { %v208_v17 = vpack.c.bf16 %v295_v4, %v285_v2  ;;  %v210_v18 = vpack.c.bf16 %v290_v3, %v280_v1  ;;  %v212_v19 = vpack.c.bf16 %v315_v8, %v305_v6  ;;  %s257_s1 = smov 64   ;;  %v214_v21 = vpack.c.bf16 %v310_v7, %v300_v5  ;;  %s207_s14 = sshll.u32 %s254_s13, 2  ;;  %s254_s13 = sphi %s357_s13, %s35_s13  }
   0x8   : > { %v206_v20 = vld.sshfl [vmem:[#allocation3] sm:$0x3 pattern:$0x76325410]  ;;  %v258_v22 = vmov 0.0   ;;  %v216_v23 = vpack.c.bf16 %v335_v12, %v325_v10  ;;  %v218_v24 = vpack.c.bf16 %v330_v11, %v320_v9  ;;  %v220_v25 = vpack.c.bf16 %v355_v16, %v345_v14  ;;  %s38_s17 = scalar_lea.vmem %s397_s0, %s207_s14  ;;  %s201_s18 = sshll.u32 %s254_s13, 1 }
   0x9   : > { %209 = vmatprep.subr.bf16.mxu0 %v208_v17  ;;  %157 = vrot.lane.b32.xlu0 %v206_v20, %s257_s1  ;;  %v222_v26 = vpack.c.bf16 %v350_v15, %v340_v13  ;;  %v40_v27 = vld [vmem:[#allocation2] sm:$0x3]  ;;  %vm42_vm1 = vcmask 523264   ;;  %v259_v28 = vmov 1983009808   ;;  %v123_v30 = vlaneseq  ;;  %s186_s21 = scalar_lea.vmem %s399_s2, %s201_s18  ;;  %s35_s13 = sadd.s32 1, %s254_s13  }
   0xa   : > { %211 = vmatpush1.bf16.msra.mxu0 %v210_v18  ;;  %110 = vmatprep.mubr.f32.mxu0 %v258_v22  ;;  %v121_v29 = vunpack.c.l.s4 %v259_v28  ;;  %v39_v37 = vld [vmem:[%s38_s17] sm:$0xf]  ;;  %p32_p0 = scmp.ge.s32.totalorder %s35_s13, 8  }
   0xb   : > { %213 = vmatprep.subr.bf16.mxu0 %v212_v19  ;;  %v124_v32 = vshrl.u32 %v123_v30, 7 }
   0xc   : > { %v122_v31 = vunpack.c.0.s8 %v121_v29 }
   0xe   : > { %215 = vmatpush1.bf16.msra.mxu0 %v214_v21  ;;  %v125_v34 = vsub.s32 %v122_v31, %v124_v32 }
   0xf   : > { %217 = vmatprep.subr.bf16.mxu0 %v216_v23 }
  0x12   : > { %219 = vmatpush1.bf16.msra.mxu0 %v218_v24 }
  0x13   : > { %221 = vmatprep.subr.bf16.mxu0 %v220_v25 }
  0x16   : > { %223 = vmatpush1.bf16.msra.mxu0 %v222_v26 }
  0x19   : > { %203 = vmatmul.mubr.msk.f32.vlgmr.msra.gmra.mrb[0].mxu0 %vm42_vm1, %v40_v27 }
  0x7b   : > { %v158_v47 = vpop.permute.xlu0 %157 }
  0xec   : > { %v112_v33 = vpop.f32.mrb[0].mxu0 }
  0xed   : > { %v114_v35 = vpop.f32.mrb[1].mxu0 }
  0xee   : > { %v119_v36 = vcombine.low %v112_v33, %v114_v35 }
  0xf0   : > { %v126_v38 = vrot.slane %v119_v36, %v125_v34 }
  0xf2   : > { %v128_v39 = vadd.f32 %v126_v38, %v39_v37 }
  0xf4   : > { %139 = vrot.lane.b32.xlu1 %v128_v39, %s257_s1  ;;  %v204_v40 = vmul.f32 -1.442695, %v128_v39  ;;  %v136_v41 = vrot.slane %v128_v39, 2 }
  0xf6   : > { %236 = vpow2.f32 %v204_v40 }
  0xf7   : > { %238 = vtanh.f32 %v136_v41 }
 0x100   : > { %v237_v42 = vpop.eup %236 }
 0x101   : > { %v132_v43 = vadd.f32 1.0, %v237_v42  ;;  %v239_v44 = vpop.eup %238 }
 0x103   : > { %240 = vrcp.f32 %v132_v43 }
 0x10d   : > { %v241_v45 = vpop.eup %240 }
 0x10e   : > { %v161_v46 = vmul.f32 %v241_v45, %v239_v44  ;;  %v160_v48 = vmul.f32 %v241_v45, %v158_v47 }
 0x110   : > { %163 = vrot.lane.b32.xlu0 %v161_v46, %s257_s1 }
 0x166   : > { %v140_v53 = vpop.permute.xlu1 %139 }
 0x167   : > { %v141_v54 = vrot.slane %v140_v53, 2 }
 0x169   : > { %v205_v55 = vmul.f32 -1.442695, %v141_v54 }
 0x182   : > { %v164_v49 = vpop.permute.xlu0 %163 }
 0x183   : > { %v166_v50 = vadd.f32 %v164_v49, %v160_v48 }
 0x185   : > { %242 = vtanh.f32 %v166_v50  ;;  %v181_v51 = vrot.slane %v166_v50, %v125_v34 }
 0x186   : > { %244 = vpow2.f32 %v205_v55 }
 0x187   : > { %182 = vrot.lane.b32.xlu0 %v181_v51, %s257_s1 }
 0x18f   : > { %v243_v52 = vpop.eup %242 }
 0x190   : > { %169 = vrot.lane.b32.xlu1 %v243_v52, %s257_s1  ;;  %v245_v56 = vpop.eup %244 }
 0x191   : > { %v146_v57 = vadd.f32 1.0, %v245_v56 }
 0x193   : > { %246 = vrcp.f32 %v146_v57 }
 0x19d   : > { %v247_v59 = vpop.eup %246 }
 0x1f9   : > { %v183_v58 = vpop.permute.xlu0 %182 }
 0x1fa   : > { %185 = vst.msk [vmem:[#allocation3] sm:$0x3] %vm11_vm0, %v183_v58 }
 0x1ff   :  { %34 = sbr.rel (!%p32_p0) target bundleno = 7 (0x7), region = 37 }
 0x202   : > { %v170_v60 = vpop.permute.xlu1 %169 }
 0x203   : > { %v172_v61 = vmul.f32 %v247_v59, %v170_v60 }
 0x205   : > { %173 = vst.msk [vmem:[#allocation2] sm:$0x3] %vm11_vm0, %v172_v61  ;;  %187 = vst.msk [vmem:[%s186_s21] sm:$0x3] %vm11_vm0, %v172_v61 }

</bundles_post_ra>
